<compile_context>
chip_gen: v7x
topology: tpu7x:2x2x1
jax: 0.10.0
libtpu: 0.0.40
codegen_flags: <defaults>
</compile_context>

<pallas_src>
import jax
import jax.numpy as jnp
import numpy as np
from jax import lax
from jax.experimental import pallas as pl
from jax.experimental.pallas import tpu as pltpu

NUM_CLASSES = 12
STRIDE = 2
PADDING = 7
OUTPUT_PADDING = 7
KSIZE = 1
IN_CHANNELS = 6


def _out_size(n):
    # ConvTranspose2d output size formula (dilation=1).
    return (n - 1) * STRIDE - 2 * PADDING + KSIZE + OUTPUT_PADDING


def fused_convt_onehot_kernel(w_ref, b_ref, x_ref, o_ref):
    """Fused forward pass.

    w_ref: (C,)  f32 SMEM  -- 1x1 conv-transpose weights (per input channel)
    b_ref: (1,)  f32 SMEM  -- bias
    x_ref: (C, H, W) f32 VMEM
    o_ref: (NUM_CLASSES, Ho, Wo) f32 VMEM  -- class-major output
    """
    C, H, W = x_ref.shape
    _, HO, WO = o_ref.shape

    # --- 1x1 transposed-conv channel contraction: unrolled VPU FMA over C=6.
    # Weights are SMEM scalars (no padded (C,1,1) VMEM tile, no axis-0 reduce).
    y = w_ref[0] * x_ref[0]
    for c in range(1, C):
        y = y + w_ref[c] * x_ref[c]                      # (H, W)

    bias = b_ref[0]

    # --- stride-2 scatter + bias, done in-kernel.
    # Output row r receives input row ir iff r == STRIDE*ir - PADDING; the
    # scatter is separable, so it is two tiny matmuls with 0/1 selection
    # matrices built from iota (HIGHEST precision keeps the pass-through exact).
    r_idx = lax.broadcasted_iota(jnp.int32, (HO, H), 0)
    ir_idx = lax.broadcasted_iota(jnp.int32, (HO, H), 1)
    sel_rows = (r_idx + PADDING == STRIDE * ir_idx).astype(jnp.float32)     # (HO, H)

    ic_idx = lax.broadcasted_iota(jnp.int32, (W, WO), 0)
    c_idx = lax.broadcasted_iota(jnp.int32, (W, WO), 1)
    sel_cols_t = (c_idx + PADDING == STRIDE * ic_idx).astype(jnp.float32)   # (W, WO)

    v2 = jnp.dot(
        jnp.dot(sel_rows, y,
                preferred_element_type=jnp.float32,
                precision=lax.Precision.HIGHEST),
        sel_cols_t,
        preferred_element_type=jnp.float32,
        precision=lax.Precision.HIGHEST,
    ) + bias                                             # (HO, WO)

    v3 = v2 * 0.125

    # TODO(synk): torch one_hot rejects float tensors (the reference raises);
    # emulate with floor + clamp into [0, NUM_CLASSES). Out-of-range pixels map
    # to class 0 / NUM_CLASSES-1 (not zeroed).
    idx = jnp.clip(jnp.floor(v2), 0.0, float(NUM_CLASSES - 1)).astype(jnp.int32)

    # dropout(p=0.0) is the identity. one_hot * v3 fused into a single select:
    # out[k, r, c] = v3[r, c] if idx[r, c] == k else 0.
    cls = lax.broadcasted_iota(jnp.int32, (NUM_CLASSES, HO, WO), 0)
    o_ref[...] = jnp.where(cls == idx[None, :, :], v3[None, :, :], 0.0)


def model_forward(x, weight, bias):
    """x: (1, C, H, W) NCHW, weight: (C, 1, 1, 1), bias: (1,)."""
    _, C, H, W = x.shape
    HO, WO = _out_size(H), _out_size(W)

    out_cls = pl.pallas_call(
        fused_convt_onehot_kernel,
        out_shape=jax.ShapeDtypeStruct((NUM_CLASSES, HO, WO), jnp.float32),
        in_specs=[
            pl.BlockSpec(memory_space=pltpu.MemorySpace.SMEM),   # weights (C,)
            pl.BlockSpec(memory_space=pltpu.MemorySpace.SMEM),   # bias (1,)
            pl.BlockSpec(memory_space=pltpu.MemorySpace.VMEM),   # x (C, H, W)
        ],
        out_specs=pl.BlockSpec(memory_space=pltpu.MemorySpace.VMEM),
    )(weight[:, 0, 0, 0], bias, x[0])

    # Layout plumbing only (outside the kernel): class-major -> NCHW + class.
    return jnp.transpose(out_cls, (1, 2, 0)).reshape(1, 1, HO, WO, NUM_CLASSES)


def _reference(x, weight, bias):
    """Pure-JAX reference with the same reinterpretation (exact scatter)."""
    w = weight[:, 0, 0, 0]
    xc = x[0]
    y = w[0] * xc[0]
    for c in range(1, xc.shape[0]):
        y = y + w[c] * xc[c]
    H, W = y.shape
    HO, WO = _out_size(H), _out_size(W)
    ih0 = -(-PADDING // STRIDE)
    oh0 = STRIDE * ih0 - PADDING
    nH = min(H - 1, (HO - 1 + PADDING) // STRIDE) - ih0 + 1
    iw0 = -(-PADDING // STRIDE)
    ow0 = STRIDE * iw0 - PADDING
    nW = min(W - 1, (WO - 1 + PADDING) // STRIDE) - iw0 + 1
    v2 = jnp.full((HO, WO), bias[0], dtype=jnp.float32)
    v2 = v2.at[oh0:oh0 + STRIDE * nH:STRIDE,
               ow0:ow0 + STRIDE * nW:STRIDE].set(
        y[ih0:ih0 + nH, iw0:iw0 + nW] + bias[0])
    v3 = v2 * 0.125
    idx = jnp.clip(jnp.floor(v2), 0.0, float(NUM_CLASSES - 1)).astype(jnp.int32)
    onehot = jax.nn.one_hot(idx, NUM_CLASSES, dtype=jnp.float32)
    return (v3[..., None] * onehot).reshape(1, 1, HO, WO, NUM_CLASSES)


if __name__ == "__main__":
    key = jax.random.PRNGKey(0)
    k1, k2, k3 = jax.random.split(key, 3)

    H = W = 16  # small spatial size; in_channels fixed at 6 by the module
    x = jax.random.normal(k1, (1, IN_CHANNELS, H, W), dtype=jnp.float32)
    weight = jax.random.normal(k2, (IN_CHANNELS, 1, 1, 1), dtype=jnp.float32) * 0.4
    bias = jax.random.normal(k3, (1,), dtype=jnp.float32) * 0.1

    out = jax.jit(model_forward)(x, weight, bias)
    jax.block_until_ready(out)
    assert out.shape == (1, 1, _out_size(H), _out_size(W), NUM_CLASSES)

    ref = _reference(x, weight, bias)
    np.testing.assert_allclose(np.asarray(out), np.asarray(ref), rtol=1e-5, atol=1e-5)

    print("KERNEL_OK")
</pallas_src>

<mosaic_0001>
module attributes {stable_mosaic.version = 11 : i64} {
  func.func @fused_convt_onehot_kernel(%arg0: memref<6xf32, #tpu.memory_space<smem>>, %arg1: memref<1xf32, #tpu.memory_space<smem>>, %arg2: memref<6x16x16xf32, #tpu.memory_space<vmem>>, %arg3: memref<12x24x24xf32, #tpu.memory_space<vmem>>) attributes {dimension_semantics = [], scalar_prefetch = 0 : i64, scratch_operands = 0 : i64, tpu.core_type = #tpu.core_type<tc>} {
    %c0 = arith.constant 0 : index
    %0 = memref.load %arg0[%c0] : memref<6xf32, #tpu.memory_space<smem>>
    %c0_0 = arith.constant 0 : index
    %c0_1 = arith.constant 0 : index
    %c0_2 = arith.constant 0 : index
    %1 = vector.load %arg2[%c0_0, %c0_1, %c0_2] : memref<6x16x16xf32, #tpu.memory_space<vmem>>, vector<1x16x16xf32>
    %2 = vector.shape_cast %1 : vector<1x16x16xf32> to vector<16x16xf32>
    %3 = vector.broadcast %0 : f32 to vector<16x16xf32>
    %4 = arith.mulf %3, %2 : vector<16x16xf32>
    %c1 = arith.constant 1 : index
    %5 = memref.load %arg0[%c1] : memref<6xf32, #tpu.memory_space<smem>>
    %c1_3 = arith.constant 1 : index
    %c0_4 = arith.constant 0 : index
    %c0_5 = arith.constant 0 : index
    %6 = vector.load %arg2[%c1_3, %c0_4, %c0_5] : memref<6x16x16xf32, #tpu.memory_space<vmem>>, vector<1x16x16xf32>
    %7 = vector.shape_cast %6 : vector<1x16x16xf32> to vector<16x16xf32>
    %8 = vector.broadcast %5 : f32 to vector<16x16xf32>
    %9 = arith.mulf %8, %7 : vector<16x16xf32>
    %10 = arith.addf %4, %9 : vector<16x16xf32>
    %c2 = arith.constant 2 : index
    %11 = memref.load %arg0[%c2] : memref<6xf32, #tpu.memory_space<smem>>
    %c2_6 = arith.constant 2 : index
    %c0_7 = arith.constant 0 : index
    %c0_8 = arith.constant 0 : index
    %12 = vector.load %arg2[%c2_6, %c0_7, %c0_8] : memref<6x16x16xf32, #tpu.memory_space<vmem>>, vector<1x16x16xf32>
    %13 = vector.shape_cast %12 : vector<1x16x16xf32> to vector<16x16xf32>
    %14 = vector.broadcast %11 : f32 to vector<16x16xf32>
    %15 = arith.mulf %14, %13 : vector<16x16xf32>
    %16 = arith.addf %10, %15 : vector<16x16xf32>
    %c3 = arith.constant 3 : index
    %17 = memref.load %arg0[%c3] : memref<6xf32, #tpu.memory_space<smem>>
    %c3_9 = arith.constant 3 : index
    %c0_10 = arith.constant 0 : index
    %c0_11 = arith.constant 0 : index
    %18 = vector.load %arg2[%c3_9, %c0_10, %c0_11] : memref<6x16x16xf32, #tpu.memory_space<vmem>>, vector<1x16x16xf32>
    %19 = vector.shape_cast %18 : vector<1x16x16xf32> to vector<16x16xf32>
    %20 = vector.broadcast %17 : f32 to vector<16x16xf32>
    %21 = arith.mulf %20, %19 : vector<16x16xf32>
    %22 = arith.addf %16, %21 : vector<16x16xf32>
    %c4 = arith.constant 4 : index
    %23 = memref.load %arg0[%c4] : memref<6xf32, #tpu.memory_space<smem>>
    %c4_12 = arith.constant 4 : index
    %c0_13 = arith.constant 0 : index
    %c0_14 = arith.constant 0 : index
    %24 = vector.load %arg2[%c4_12, %c0_13, %c0_14] : memref<6x16x16xf32, #tpu.memory_space<vmem>>, vector<1x16x16xf32>
    %25 = vector.shape_cast %24 : vector<1x16x16xf32> to vector<16x16xf32>
    %26 = vector.broadcast %23 : f32 to vector<16x16xf32>
    %27 = arith.mulf %26, %25 : vector<16x16xf32>
    %28 = arith.addf %22, %27 : vector<16x16xf32>
    %c5 = arith.constant 5 : index
    %29 = memref.load %arg0[%c5] : memref<6xf32, #tpu.memory_space<smem>>
    %c5_15 = arith.constant 5 : index
    %c0_16 = arith.constant 0 : index
    %c0_17 = arith.constant 0 : index
    %30 = vector.load %arg2[%c5_15, %c0_16, %c0_17] : memref<6x16x16xf32, #tpu.memory_space<vmem>>, vector<1x16x16xf32>
    %31 = vector.shape_cast %30 : vector<1x16x16xf32> to vector<16x16xf32>
    %32 = vector.broadcast %29 : f32 to vector<16x16xf32>
    %33 = arith.mulf %32, %31 : vector<16x16xf32>
    %34 = arith.addf %28, %33 : vector<16x16xf32>
    %c0_18 = arith.constant 0 : index
    %35 = memref.load %arg1[%c0_18] : memref<1xf32, #tpu.memory_space<smem>>
    %36 = tpu.iota {dimensions = array<i32: 0>} : vector<24x16xi32>
    %37 = tpu.iota {dimensions = array<i32: 1>} : vector<24x16xi32>
    %c7_i32 = arith.constant 7 : i32
    %38 = vector.broadcast %c7_i32 : i32 to vector<24x16xi32>
    %39 = arith.addi %36, %38 : vector<24x16xi32>
    %c2_i32 = arith.constant 2 : i32
    %40 = vector.broadcast %c2_i32 : i32 to vector<24x16xi32>
    %41 = arith.muli %40, %37 : vector<24x16xi32>
    %42 = arith.cmpi eq, %39, %41 : vector<24x16xi32>
    %43 = arith.extui %42 : vector<24x16xi1> to vector<24x16xi32>
    %44 = arith.sitofp %43 : vector<24x16xi32> to vector<24x16xf32>
    %45 = tpu.iota {dimensions = array<i32: 0>} : vector<16x24xi32>
    %46 = tpu.iota {dimensions = array<i32: 1>} : vector<16x24xi32>
    %c7_i32_19 = arith.constant 7 : i32
    %47 = vector.broadcast %c7_i32_19 : i32 to vector<16x24xi32>
    %48 = arith.addi %46, %47 : vector<16x24xi32>
    %c2_i32_20 = arith.constant 2 : i32
    %49 = vector.broadcast %c2_i32_20 : i32 to vector<16x24xi32>
    %50 = arith.muli %49, %45 : vector<16x24xi32>
    %51 = arith.cmpi eq, %48, %50 : vector<16x24xi32>
    %52 = arith.extui %51 : vector<16x24xi1> to vector<16x24xi32>
    %53 = arith.sitofp %52 : vector<16x24xi32> to vector<16x24xf32>
    %cst = arith.constant dense<0.000000e+00> : vector<24x16xf32>
    %54 = tpu.matmul %44, %34, %cst {dimension_numbers = #tpu.dot_dimension_numbers<[1], [0], [0], [1], [0, 0, 1, 1], [], []>, precision = #tpu.contract_precision<fp32>} : vector<24x16xf32>, vector<16x16xf32>, vector<24x16xf32> -> vector<24x16xf32>
    %cst_21 = arith.constant dense<0.000000e+00> : vector<24x24xf32>
    %55 = tpu.matmul %54, %53, %cst_21 {dimension_numbers = #tpu.dot_dimension_numbers<[1], [0], [0], [1], [0, 0, 1, 1], [], []>, precision = #tpu.contract_precision<fp32>} : vector<24x16xf32>, vector<16x24xf32>, vector<24x24xf32> -> vector<24x24xf32>
    %56 = vector.broadcast %35 : f32 to vector<24x24xf32>
    %57 = arith.addf %55, %56 : vector<24x24xf32>
    %cst_22 = arith.constant 1.250000e-01 : f32
    %58 = vector.broadcast %cst_22 : f32 to vector<24x24xf32>
    %59 = arith.mulf %57, %58 : vector<24x24xf32>
    %60 = math.floor %57 : vector<24x24xf32>
    %cst_23 = arith.constant 0.000000e+00 : f32
    %cst_24 = arith.constant 1.100000e+01 : f32
    %61 = vector.broadcast %cst_23 : f32 to vector<24x24xf32>
    %62 = arith.maximumf %61, %60 : vector<24x24xf32>
    %63 = vector.broadcast %cst_24 : f32 to vector<24x24xf32>
    %64 = arith.minimumf %63, %62 : vector<24x24xf32>
    %65 = arith.fptosi %64 : vector<24x24xf32> to vector<24x24xi32>
    %66 = tpu.iota {dimensions = array<i32: 0>} : vector<12x24x24xi32>
    %67 = vector.shape_cast %65 : vector<24x24xi32> to vector<1x24x24xi32>
    %68 = vector.broadcast %67 : vector<1x24x24xi32> to vector<12x24x24xi32>
    %69 = arith.cmpi eq, %66, %68 : vector<12x24x24xi32>
    %70 = vector.shape_cast %59 : vector<24x24xf32> to vector<1x24x24xf32>
    %cst_25 = arith.constant 0.000000e+00 : f32
    %71 = vector.shape_cast %70 : vector<1x24x24xf32> to vector<1x24x24xf32>
    %72 = vector.broadcast %71 : vector<1x24x24xf32> to vector<12x24x24xf32>
    %73 = vector.broadcast %cst_25 : f32 to vector<12x24x24xf32>
    %74 = arith.select %69, %72, %73 : vector<12x24x24xi1>, vector<12x24x24xf32>
    %c0_26 = arith.constant 0 : index
    %c0_27 = arith.constant 0 : index
    %c0_28 = arith.constant 0 : index
    %75 = vector.load %arg3[%c0_26, %c0_27, %c0_28] : memref<12x24x24xf32, #tpu.memory_space<vmem>>, vector<12x24x24xf32>
    tpu.vector_store %arg3[%c0_26, %c0_27, %c0_28], %74 {strides = array<i32>} : memref<12x24x24xf32, #tpu.memory_space<vmem>>, vector<12x24x24xf32>,
    return
  }
}

</mosaic_0001>

<bundles_post_ra>
// kernel: model_forward.1
= control target key start
LH: loop header
LB: loop body
LE: loop exit
PB: predicated region body
PF: predicated region fallthrough
CT: control target
= control target key end

     0   :  { %9 = vsyncpa [#allocation6], 0  ;;  %s2075_s0 = inlined_call_operand.vmem [shape: f32[6], index: 0, kind: input, shape index: {}]   ;;  %s2076_s1 = inlined_call_operand.<no memory space> [shape: f32[1], index: 1, kind: input, shape index: {}]   ;;  %s2077_s2 = inlined_call_operand.hbm [shape: f32[6,16,16], index: 2, kind: input, shape index: {}]   ;;  %s2078_s3 = inlined_call_operand.hbm [shape: f32[12,24,24], index: 3, kind: output, shape index: {}]  }
   0x1   :  { %10 = vsyncpa [#allocation4], 0 }
   0x2   :  { %11 = vsyncpa [#allocation5], 0  ;;  %s18_s14 = sshll.u32 %s2075_s0, 4  ;;  %s19_s14 = int_to_ptr.vmem [resolvable:$true] %s18_s14 }
   0x3   :  { %s1730_s15 = scalar_lea.vmem %s19_s14, 16  ;;  %p1735_p1 = scmp.lt.s32.totalorder %s19_s14, %s19_s14 }
   0x4   :  { %p1731_p0 = scmp.ne.s32.totalorder %s19_s14, %s1730_s15  ;;  %p1736_p2 = scmp.lt.s32.totalorder %s1730_s15, %s1730_s15 }
   0x6   :  { %p1737_p3 = por %p1736_p2, %p1735_p1 }
   0x8   :  { %p1738_p4 = pnand %p1737_p3, %p1731_p0 }
   0xa   :  { %1741 = shalt.err (!%p1738_p4)
}
   0xb   :  { %s1792_s16 = smov [#allocation3]   ;;  %s1793_s17 = smov [#allocation7]  }
   0xc   :  { %21 = dma.vmem_to_smem %s19_s14, 16, %s1792_s16, [#allocation6]  }
   0xd   :  { %s29_s18 = sshll.u32 %s1793_s17, 4  ;;  %s1742_s21 = scalar_lea.hbm %s2077_s2, 1536  ;;  %s30_s18 = int_to_ptr.vmem [resolvable:$true] %s29_s18 }
   0xe   :  { %p1743_p5 = scmp.ne.s32.totalorder %s2077_s2, %s1742_s21  ;;  %p1746_p6 = scmp.lt.u32.totalorder %s1742_s21, %s2077_s2 }
  0x10   :  { %p1748_p7 = pnand %p1746_p6, %p1743_p5 }
  0x12   :  { %1751 = shalt.err (!%p1748_p7)
}
  0x13   :  { %s1752_s25 = scalar_lea.vmem %s30_s18, 1536  ;;  %p1757_p9 = scmp.lt.s32.totalorder %s30_s18, %s30_s18 }
  0x14   :  { %p1753_p8 = scmp.ne.s32.totalorder %s30_s18, %s1752_s25  ;;  %p1758_p10 = scmp.lt.s32.totalorder %s1752_s25, %s1752_s25 }
  0x16   :  { %p1759_p11 = por %p1758_p10, %p1757_p9 }
  0x18   :  { %p1760_p12 = pnand %p1759_p11, %p1753_p8 }
  0x1a   :  { %1763 = shalt.err (!%p1760_p12)
}
  0x1b   :  { %s1794_s26 = smov 128   ;;  %s1795_s27 = smov 8  }
  0x1c   :  { %35 = dma.hbm_to_vmem [thread:$0]  %s2077_s2, 1536, %s30_s18, [#allocation4], %s1794_s26, %s1794_s26, %s1795_s27  }
  0x1d   :  { %1786 = dma.done.wait [#allocation6], 16  }
  0x1e   :  { %1787 = vsyncadd [#allocation6], 4294967280 }
  0x1f   :  { %1788 = dma.done.wait [#allocation4], 1536  }
  0x20   :  { %1789 = vsyncadd [#allocation4], 4294965760 }
  0x21   :  { %42 = sfence }
  0x22   :  { %s43_s30 = sld [smem:[#allocation3]]  ;;  %v95_v0 = vlaneseq  ;;  %v1796_v1 = vmov 0.0|0.0   ;;  %s1375_s4 = sld [smem:[#allocation3 + $0x1]]  ;;  %v44_v2 = vld [vmem:[#allocation7] sm:$0xff]  ;;  %v45_v3 = vld [vmem:[#allocation7 + $0x8] sm:$0xff]  ;;  %v51_v4 = vld [vmem:[#allocation7 + $0x10] sm:$0xff] }
  0x23   :  { %1616 = vmatprep.subr.bf16.mxu0 %v1796_v1  ;;  %s1840_s5 = sld [smem:[#allocation3 + $0x2]]  ;;  %1634 = vmatprep.subr.bf16.mxu1 %v1796_v1  ;;  %s1843_s6 = sld [smem:[#allocation3 + $0x3]]  ;;  %v52_v7 = vld [vmem:[#allocation7 + $0x18] sm:$0xff]  ;;  %v60_v8 = vld [vmem:[#allocation7 + $0x20] sm:$0xff]  ;;  %v61_v9 = vld [vmem:[#allocation7 + $0x28] sm:$0xff]  ;;  %vm1797_vm0 = vmmov 0  }
  0x24   :  { %s1845_s7 = sld [smem:[#allocation3 + $0x4]]  ;;  %s1847_s2 = sld [smem:[#allocation3 + $0x5]]  ;;  %v1849_v5 = vshrl.u32 %v95_v0, 7  ;;  %v1851_v6 = vand.u32 127, %v95_v0  ;;  %v1798_v10 = vmov 0.0   ;;  %vm123_vm1 = vcmask 130048  }
  0x25   :  { %1464 = vmatprep.mubr.msk.f32.mxu0 %vm1797_vm0, %v1798_v10  ;;  %1542 = vmatprep.mubr.msk.f32.mxu1 %vm1797_vm0, %v1798_v10  ;;  %v69_v19 = vld [vmem:[#allocation7 + $0x30] sm:$0xff]  ;;  %v70_v20 = vld [vmem:[#allocation7 + $0x38] sm:$0xff]  ;;  %v78_v25 = vld [vmem:[#allocation7 + $0x40] sm:$0xff]  ;;  %vm1320_vm8 = vcmask 195584  }
  0x26   :  { %v101_v12 = vadd.s32 7, %v1849_v5  ;;  %v104_v13 = vmul.u32 2, %v1851_v6  ;;  %v1860_v14 = vadd.s32 8, %v1849_v5  ;;  %v79_v26 = vld [vmem:[#allocation7 + $0x48] sm:$0xff]  ;;  %v87_v34 = vld [vmem:[#allocation7 + $0x50] sm:$0xff]  ;;  %v88_v35 = vld [vmem:[#allocation7 + $0x58] sm:$0xff] }
  0x27   :  { %v98_v45 = vadd.s32 16, %v1849_v5 }
  0x28   :  { %v46_v11 = vstv %s43_s30  ;;  %v53_v17 = vstv %s1375_s4  ;;  %vm105_vm2 = vcmp.eq.s32.totalorder %v101_v12, %v104_v13  ;;  %v102_v41 = vadd.s32 7, %v1860_v14 }
  0x29   :  { %v47_v15 = vmul.f32 %v46_v11, %v44_v2  ;;  %v48_v16 = vmul.f32 %v46_v11, %v45_v3  ;;  %v62_v18 = vstv %s1840_s5  ;;  %v54_v21 = vmul.f32 %v53_v17, %v51_v4 }
  0x2a   :  { %v55_v22 = vmul.f32 %v53_v17, %v52_v7  ;;  %v63_v23 = vmul.f32 %v62_v18, %v60_v8  ;;  %v64_v24 = vmul.f32 %v62_v18, %v61_v9  ;;  %v71_v27 = vstv %s1843_s6 }
  0x2b   :  { %v80_v28 = vstv %s1845_s7  ;;  %v89_v29 = vstv %s1847_s2  ;;  %v56_v30 = vadd.f32 %v54_v21, %v47_v15  ;;  %v72_v32 = vmul.f32 %v71_v27, %v69_v19 }
  0x2c   :  { %v57_v31 = vadd.f32 %v55_v22, %v48_v16  ;;  %v73_v33 = vmul.f32 %v71_v27, %v70_v20  ;;  %v81_v36 = vmul.f32 %v80_v28, %v78_v25  ;;  %v82_v37 = vmul.f32 %v80_v28, %v79_v26 }
  0x2d   :  { %v65_v38 = vadd.f32 %v63_v23, %v56_v30  ;;  %v1867_v40 = vsel %vm105_vm2, 1.0, %v1798_v10  ;;  %v90_v42 = vmul.f32 %v89_v29, %v87_v34  ;;  %v91_v43 = vmul.f32 %v89_v29, %v88_v35 }
  0x2e   :  { %v66_v39 = vadd.f32 %v64_v24, %v57_v31  ;;  %v125_v44 = vsel %vm123_vm1, %v1867_v40, 0  ;;  %vm106_vm3 = vcmp.eq.s32.totalorder %v102_v41, %v104_v13  ;;  %v103_v50 = vadd.s32 7, %v98_v45 }
  0x2f   :  { %v74_v46 = vadd.f32 %v72_v32, %v65_v38  ;;  %v1873_v48 = vsub.f32 %v125_v44, %v125_v44  ;;  %v1876_v49 = vsel %vm106_vm3, 1.0, %v1798_v10  ;;  %v114_v24 = vadd.s32 7, %v1851_v6 }
  0x30   :  { %v75_v47 = vadd.f32 %v73_v33, %v66_v39  ;;  %v128_v54 = vsel %vm123_vm1, %v1876_v49, 0  ;;  %vm107_vm4 = vcmp.eq.s32.totalorder %v103_v50, %v104_v13  ;;  %v115_v25 = vmul.u32 2, %v1849_v5 }
  0x31   :  { %v83_v51 = vadd.f32 %v81_v36, %v74_v46  ;;  %v202_v53 = vand.u32 4294901760, %v1873_v48  ;;  %v211_v55 = vsub.f32 %v128_v54, %v128_v54  ;;  %v1882_v58 = vsel %vm107_vm4, 1.0, %v1798_v10 }
  0x32   :  { %v84_v52 = vadd.f32 %v82_v37, %v75_v47  ;;  %v131_v61 = vsel %vm123_vm1, %v1882_v58, 0  ;;  %v116_v26 = vmul.u32 2, %v1860_v14  ;;  %vm117_vm5 = vcmp.eq.s32.totalorder %v114_v24, %v115_v25 }
  0x33   :  { %v92_v56 = vadd.f32 %v90_v42, %v83_v51  ;;  %v203_v59 = vsub.f32 %v1873_v48, %v202_v53  ;;  %v212_v60 = vand.u32 4294901760, %v211_v55  ;;  %v221_v0 = vsub.f32 %v131_v61, %v131_v61 }
  0x34   :  { %v93_v57 = vadd.f32 %v91_v43, %v84_v52  ;;  %vm118_vm6 = vcmp.eq.s32.totalorder %v114_v24, %v116_v26  ;;  %v1799_v28 = vmov 1.0|1.0   ;;  %v1383_v29 = vsel %vm117_vm5, 1.0, %v1798_v10 }
  0x35   :  { %v134_v62 = vand.u32 4294901760, %v92_v56  ;;  %v204_v7 = vand.u32 4294901760, %v203_v59  ;;  %v213_v8 = vsub.f32 %v211_v55, %v212_v60  ;;  %v222_v9 = vand.u32 4294901760, %v221_v0  ;;  %vm1948_vm7 = vmpackc.low %vm118_vm6, %vm117_vm5 }
  0x36   :  { %v137_v63 = vand.u32 4294901760, %v93_v57  ;;  %1636 = vmatpush3.bf16.msk.msra.mxu1 %vm1948_vm7, %v1799_v28  ;;  %v1384_v30 = vsel %vm118_vm6, 1.0, %v1798_v10  ;;  %v787_v5 = vsub.f32 %v1383_v29, %v1383_v29 }
  0x37   :  { %v232_v3 = vsub.f32 %v92_v56, %v134_v62  ;;  %v214_v16 = vand.u32 4294901760, %v213_v8  ;;  %v223_v17 = vsub.f32 %v221_v0, %v222_v9  ;;  %1637 = vmatprep.subr.bf16.mxu1 %v1796_v1  ;;  %v794_v6 = vsub.f32 %v1384_v30, %v1384_v30 }
  0x38   :  { %v1617_v2 = vpack.c.bf16 %v137_v63, %v134_v62  ;;  %v239_v4 = vsub.f32 %v93_v57, %v137_v63  ;;  %v788_v14 = vand.u32 4294901760, %v787_v5 }
  0x39   :  { %v233_v11 = vand.u32 4294901760, %v232_v3  ;;  %v224_v21 = vand.u32 4294901760, %v223_v17  ;;  %v795_v31 = vand.u32 4294901760, %v794_v6  ;;  %v1641_v37 = vpack.c.bf16 %v794_v6, %v787_v5 }
  0x3a   :  { %1618 = vmatpush3.bf16.msra.mxu0 %v1617_v2  ;;  %v240_v12 = vand.u32 4294901760, %v239_v4  ;;  %v1623_v22 = vpack.c.bf16 %v239_v4, %v232_v3  ;;  %v789_v32 = vsub.f32 %v787_v5, %v788_v14 }
  0x3b   :  { %1619 = vmatprep.subr.bf16.mxu0 %v1796_v1  ;;  %v234_v13 = vsub.f32 %v232_v3, %v233_v11  ;;  %v796_v33 = vsub.f32 %v794_v6, %v795_v31  ;;  %v1647_v38 = vpack.c.bf16 %v795_v31, %v788_v14 }
  0x3c   :  { %v241_v15 = vsub.f32 %v239_v4, %v240_v12  ;;  %v1629_v23 = vpack.c.bf16 %v240_v12, %v233_v11  ;;  %v790_v34 = vand.u32 4294901760, %v789_v32 }
  0x3d   :  { %1465 = vmatmul.mubr.f32.vlgmr.msra.gmra.mrb[0].mxu0 %v204_v7  ;;  %v235_v18 = vand.u32 4294901760, %v234_v13  ;;  %v797_v35 = vand.u32 4294901760, %v796_v33 }
  0x3e   :  { %1467 = vmatprep.mubr.msk.f32.mxu0 %vm1797_vm0, %v1798_v10  ;;  %v242_v19 = vand.u32 4294901760, %v241_v15 }
  0x3f   :  { %v1638_v36 = vpack.c.bf16 %v797_v35, %v790_v34 }
  0x40   :  { %v1620_v20 = vpack.c.bf16 %v242_v19, %v235_v18 }
  0x41   :  { %1468 = vmatmul.mubr.f32.gmra.mrb[2].mxu0 %v214_v16 }
  0x42   :  { %1621 = vmatpush3.bf16.msra.mxu0 %v1620_v20  ;;  %1470 = vmatprep.mubr.msk.f32.mxu0 %vm1797_vm0, %v1798_v10 }
  0x43   :  { %1622 = vmatprep.subr.bf16.mxu0 %v1796_v1 }
  0x45   :  { %1471 = vmatmul.mubr.f32.gmra.mrb[4].mxu0 %v224_v21 }
  0x46   :  { %1477 = vmatprep.mubr.msk.f32.mxu0 %vm1797_vm0, %v1798_v10 }
  0x49   :  { %1478 = vmatmul.mubr.msk.f32.vlgmr.msra.gmra.mrb[0].mxu0 %vm123_vm1, %v1867_v40 }
  0x4a   :  { %1480 = vmatprep.mubr.msk.f32.mxu0 %vm1797_vm0, %v1798_v10  ;;  %1624 = vmatpush3.bf16.msra.mxu0 %v1623_v22 }
  0x4b   :  { %1625 = vmatprep.subr.bf16.mxu0 %v1796_v1 }
  0x4d   :  { %1481 = vmatmul.mubr.msk.f32.gmra.mrb[2].mxu0 %vm123_vm1, %v1876_v49 }
  0x4e   :  { %1483 = vmatprep.mubr.msk.f32.mxu0 %vm1797_vm0, %v1798_v10 }
  0x51   :  { %1484 = vmatmul.mubr.msk.f32.gmra.mrb[4].mxu0 %vm123_vm1, %v1882_v58 }
  0x52   :  { %1490 = vmatprep.mubr.msk.f32.mxu0 %vm1797_vm0, %v1798_v10 }
  0x55   :  { %1491 = vmatmul.mubr.f32.vlgmr.msra.gmra.mrb[0].mxu0 %v1873_v48 }
  0x56   :  { %1493 = vmatprep.mubr.msk.f32.mxu0 %vm1797_vm0, %v1798_v10  ;;  %1627 = vmatpush3.bf16.msra.mxu0 %v1617_v2 }
  0x57   :  { %1628 = vmatprep.subr.bf16.mxu0 %v1796_v1 }
  0x59   :  { %1494 = vmatmul.mubr.f32.gmra.mrb[2].mxu0 %v211_v55 }
  0x5a   :  { %1496 = vmatprep.mubr.msk.f32.mxu0 %vm1797_vm0, %v1798_v10 }
  0x5d   :  { %1497 = vmatmul.mubr.f32.gmra.mrb[4].mxu0 %v221_v0 }
  0x5e   :  { %1503 = vmatprep.mubr.msk.f32.mxu0 %vm1797_vm0, %v1798_v10 }
  0x61   :  { %1504 = vmatmul.mubr.f32.vlgmr.msra.gmra.mrb[0].mxu0 %v202_v53 }
  0x62   :  { %1506 = vmatprep.mubr.msk.f32.mxu0 %vm1797_vm0, %v1798_v10  ;;  %1630 = vmatpush3.bf16.msra.mxu0 %v1629_v23 }
  0x63   :  { %1631 = vmatprep.subr.bf16.mxu0 %v1796_v1 }
  0x65   :  { %1507 = vmatmul.mubr.f32.gmra.mrb[2].mxu0 %v212_v60 }
  0x66   :  { %1509 = vmatprep.mubr.msk.f32.mxu0 %vm1797_vm0, %v1798_v10 }
  0x69   :  { %1510 = vmatmul.mubr.f32.gmra.mrb[4].mxu0 %v222_v9 }
  0x6a   :  { %1516 = vmatprep.mubr.msk.f32.mxu0 %vm1797_vm0, %v1798_v10 }
  0x6d   :  { %1517 = vmatmul.mubr.msk.f32.vlgmr.msra.gmra.mrb[0].mxu0 %vm123_vm1, %v1867_v40 }
  0x6e   :  { %1519 = vmatprep.mubr.msk.f32.mxu0 %vm1797_vm0, %v1798_v10  ;;  %1633 = vmatpush3.bf16.msra.mxu0 %v1617_v2 }
  0x71   :  { %1520 = vmatmul.mubr.msk.f32.gmra.mrb[2].mxu0 %vm123_vm1, %v1876_v49 }
  0x72   :  { %1522 = vmatprep.mubr.msk.f32.mxu0 %vm1797_vm0, %v1798_v10 }
  0x75   :  { %1523 = vmatmul.mubr.msk.f32.gmra.mrb[4].mxu0 %vm123_vm1, %v1882_v58 }
  0x76   :  { %1529 = vmatprep.mubr.msk.f32.mxu0 %vm1797_vm0, %v1798_v10 }
  0x79   :  { %1530 = vmatmul.mubr.msk.f32.vlgmr.msra.gmra.mrb[0].mxu0 %vm123_vm1, %v1867_v40 }
  0x7a   :  { %1532 = vmatprep.mubr.msk.f32.mxu0 %vm1797_vm0, %v1798_v10 }
  0x7d   :  { %1533 = vmatmul.mubr.msk.f32.gmra.mrb[2].mxu0 %vm123_vm1, %v1876_v49 }
  0x7e   :  { %1535 = vmatprep.mubr.msk.f32.mxu0 %vm1797_vm0, %v1798_v10 }
  0x81   :  { %1536 = vmatmul.mubr.msk.f32.gmra.mrb[4].mxu0 %vm123_vm1, %v1882_v58 }
 0x14c   :  { %v662_v39 = vpop.f32.mrb[0].mxu0 }
 0x14d   :  { %v680_v40 = vsel %vm123_vm1, %v662_v39, 0  ;;  %v1531_v41 = vpop.f32.mrb[1].mxu0 }
 0x14e   :  { %v755_v42 = vand.u32 4294901760, %v680_v40 }
 0x150   :  { %v756_v43 = vsub.f32 %v680_v40, %v755_v42  ;;  %v668_v44 = vpop.f32.mrb[2].mxu0 }
 0x151   :  { %v683_v45 = vsel %vm123_vm1, %v668_v44, 0  ;;  %v1534_v46 = vpop.f32.mrb[3].mxu0 }
 0x152   :  { %v757_v47 = vand.u32 4294901760, %v756_v43  ;;  %v765_v48 = vand.u32 4294901760, %v683_v45 }
 0x154   :  { %v766_v49 = vsub.f32 %v683_v45, %v765_v48  ;;  %v674_v50 = vpop.f32.mrb[4].mxu0  ;;  %v758_v51 = vsub.f32 %v756_v43, %v757_v47 }
 0x155   :  { %v686_v52 = vsel %vm123_vm1, %v674_v50, 0  ;;  %v1537_v53 = vpop.f32.mrb[5].mxu0 }
 0x156   :  { %v767_v54 = vand.u32 4294901760, %v766_v49  ;;  %v775_v55 = vand.u32 4294901760, %v686_v52  ;;  %v759_v56 = vand.u32 4294901760, %v758_v51 }
 0x158   :  { %v776_v57 = vsub.f32 %v686_v52, %v775_v55  ;;  %1543 = vmatmul.mubr.f32.vlgmr.msra.gmra.mrb[0].mxu1 %v759_v56  ;;  %v768_v58 = vsub.f32 %v766_v49, %v767_v54 }
 0x159   :  { %1545 = vmatprep.mubr.msk.f32.mxu1 %vm1797_vm0, %v1798_v10  ;;  %1639 = vmatpush3.bf16.msra.mxu1 %v1638_v36 }
 0x15a   :  { %v777_v59 = vand.u32 4294901760, %v776_v57  ;;  %v769_v60 = vand.u32 4294901760, %v768_v58  ;;  %1640 = vmatprep.subr.bf16.mxu1 %v1796_v1 }
 0x15c   :  { %1546 = vmatmul.mubr.f32.gmra.mrb[2].mxu1 %v769_v60  ;;  %v778_v61 = vsub.f32 %v776_v57, %v777_v59 }
 0x15d   :  { %1548 = vmatprep.mubr.msk.f32.mxu1 %vm1797_vm0, %v1798_v10 }
 0x15e   :  { %v779_v62 = vand.u32 4294901760, %v778_v61 }
 0x160   :  { %1549 = vmatmul.mubr.f32.gmra.mrb[4].mxu1 %v779_v62 }
 0x161   :  { %1555 = vmatprep.mubr.msk.f32.mxu1 %vm1797_vm0, %v1798_v10 }
 0x164   :  { %1556 = vmatmul.mubr.f32.vlgmr.msra.gmra.mrb[0].mxu1 %v755_v42 }
 0x165   :  { %1558 = vmatprep.mubr.msk.f32.mxu1 %vm1797_vm0, %v1798_v10  ;;  %1642 = vmatpush3.bf16.msra.mxu1 %v1641_v37 }
 0x166   :  { %1643 = vmatprep.subr.bf16.mxu1 %v1796_v1 }
 0x168   :  { %1559 = vmatmul.mubr.f32.gmra.mrb[2].mxu1 %v765_v48 }
 0x169   :  { %1561 = vmatprep.mubr.msk.f32.mxu1 %vm1797_vm0, %v1798_v10 }
 0x16c   :  { %1562 = vmatmul.mubr.f32.gmra.mrb[4].mxu1 %v775_v55 }
 0x16d   :  { %1568 = vmatprep.mubr.msk.f32.mxu1 %vm1797_vm0, %v1798_v10 }
 0x170   :  { %1569 = vmatmul.mubr.f32.vlgmr.msra.gmra.mrb[0].mxu1 %v756_v43 }
 0x171   :  { %1571 = vmatprep.mubr.msk.f32.mxu1 %vm1797_vm0, %v1798_v10  ;;  %1645 = vmatpush3.bf16.msk.msra.mxu1 %vm1948_vm7, %v1799_v28 }
 0x172   :  { %1646 = vmatprep.subr.bf16.mxu1 %v1796_v1 }
 0x174   :  { %1572 = vmatmul.mubr.f32.gmra.mrb[2].mxu1 %v766_v49 }
 0x175   :  { %1574 = vmatprep.mubr.msk.f32.mxu1 %vm1797_vm0, %v1798_v10 }
 0x178   :  { %1575 = vmatmul.mubr.f32.gmra.mrb[4].mxu1 %v776_v57 }
 0x179   :  { %1581 = vmatprep.mubr.msk.f32.mxu1 %vm1797_vm0, %v1798_v10 }
 0x17c   :  { %1582 = vmatmul.mubr.f32.vlgmr.msra.gmra.mrb[0].mxu1 %v757_v47 }
 0x17d   :  { %1584 = vmatprep.mubr.msk.f32.mxu1 %vm1797_vm0, %v1798_v10  ;;  %1648 = vmatpush3.bf16.msra.mxu1 %v1647_v38 }
 0x17e   :  { %1649 = vmatprep.subr.bf16.mxu1 %v1796_v1  ;;  %v678_v1 = vstv %s2076_s1  ;;  %s1800_s1 = smov [#allocation8]  }
 0x17f   :  { %s1362_s10 = sshll.u32 %s1800_s1, 4  ;;  %s1363_s10 = int_to_ptr.vmem [resolvable:$true] %s1362_s10 }
 0x180   :  { %1585 = vmatmul.mubr.f32.gmra.mrb[2].mxu1 %v767_v54  ;;  %s1764_s11 = scalar_lea.vmem %s1363_s10, 4608  ;;  %p1769_p0 = scmp.lt.s32.totalorder %s1363_s10, %s1363_s10 }
 0x181   :  { %1587 = vmatprep.mubr.msk.f32.mxu1 %vm1797_vm0, %v1798_v10  ;;  %p1765_p13 = scmp.ne.s32.totalorder %s1363_s10, %s1764_s11  ;;  %p1770_p1 = scmp.lt.s32.totalorder %s1764_s11, %s1764_s11 }
 0x183   :  { %p1771_p2 = por %p1770_p1, %p1769_p0 }
 0x184   :  { %1588 = vmatmul.mubr.f32.gmra.mrb[4].mxu1 %v777_v59 }
 0x185   :  { %1594 = vmatprep.mubr.msk.f32.mxu1 %vm1797_vm0, %v1798_v10  ;;  %p1772_p3 = pnand %p1771_p2, %p1765_p13 }
 0x188   :  { %1595 = vmatmul.mubr.f32.vlgmr.msra.gmra.mrb[0].mxu1 %v755_v42 }
 0x189   :  { %1597 = vmatprep.mubr.msk.f32.mxu1 %vm1797_vm0, %v1798_v10  ;;  %1651 = vmatpush3.bf16.msk.msra.mxu1 %vm1948_vm7, %v1799_v28 }
 0x18c   :  { %1598 = vmatmul.mubr.f32.gmra.mrb[2].mxu1 %v765_v48 }
 0x18d   :  { %1600 = vmatprep.mubr.msk.f32.mxu1 %vm1797_vm0, %v1798_v10 }
 0x190   :  { %1601 = vmatmul.mubr.f32.gmra.mrb[4].mxu1 %v775_v55 }
 0x191   :  { %1607 = vmatprep.mubr.msk.f32.mxu1 %vm1797_vm0, %v1798_v10 }
 0x194   :  { %1608 = vmatmul.mubr.f32.vlgmr.msra.gmra.mrb[0].mxu1 %v755_v42 }
 0x195   :  { %1610 = vmatprep.mubr.msk.f32.mxu1 %vm1797_vm0, %v1798_v10 }
 0x198   :  { %1611 = vmatmul.mubr.f32.gmra.mrb[2].mxu1 %v765_v48 }
 0x199   :  { %1613 = vmatprep.mubr.msk.f32.mxu1 %vm1797_vm0, %v1798_v10 }
 0x19c   :  { %1614 = vmatmul.mubr.f32.gmra.mrb[4].mxu1 %v775_v55 }
 0x267   :  { %v1217_v63 = vpop.f32.mrb[0].mxu1 }
 0x268   :  { %v1652_v0 = vadd.f32 %v1217_v63, %v678_v1  ;;  %v1609_v2 = vpop.f32.mrb[1].mxu1 }
 0x26a   :  { %v1236_v3 = vfloor.f32 %v1652_v0  ;;  %v1233_v19 = vmul.f32 0.125, %v1652_v0 }
 0x26b   :  { %v1223_v4 = vpop.f32.mrb[2].mxu1 }
 0x26c   :  { %v1239_v7 = vmax.f32 %v1236_v3, 0.0  ;;  %v1653_v8 = vadd.f32 %v1223_v4, %v678_v1  ;;  %v1612_v9 = vpop.f32.mrb[3].mxu1 }
 0x26e   :  { %v1242_v11 = vmin.f32 %v1239_v7, 11.0  ;;  %v1237_v12 = vfloor.f32 %v1653_v8  ;;  %v1234_v34 = vmul.f32 0.125, %v1653_v8 }
 0x26f   :  { %v1229_v13 = vpop.f32.mrb[4].mxu1 }
 0x270   :  { %v1715_v15 = vtrunc.f32 %v1242_v11  ;;  %v1240_v16 = vmax.f32 %v1237_v12, 0.0  ;;  %v2008_v17 = vadd.f32 %v1229_v13, %v678_v1  ;;  %v1615_v10 = vpop.f32.mrb[5].mxu1 }
 0x272   :  { %v1716_v18 = vcvt.f32.s32 %v1715_v15  ;;  %v1243_v20 = vmin.f32 %v1240_v16, 11.0  ;;  %v1238_v21 = vfloor.f32 %v2008_v17  ;;  %v1235_v50 = vmul.f32 0.125, %v2008_v17 }
 0x274   :  { %vm1248_vm9 = vcmp.eq.s32.totalorder %v1716_v18, 0  ;;  %vm1251_vm10 = vcmp.eq.s32.totalorder %v1716_v18, 1  ;;  %vm1254_vm11 = vcmp.eq.s32.totalorder %v1716_v18, 2  ;;  %vm1257_vm12 = vcmp.eq.s32.totalorder %v1716_v18, 3 }
 0x275   :  { %vm1260_vm13 = vcmp.eq.s32.totalorder %v1716_v18, 4  ;;  %vm1263_vm14 = vcmp.eq.s32.totalorder %v1716_v18, 5  ;;  %vm1266_vm15 = vcmp.eq.s32.totalorder %v1716_v18, 6  ;;  %vm1269_vm0 = vcmp.eq.s32.totalorder %v1716_v18, 7 }
 0x276   :  { %vm1272_vm1 = vcmp.eq.s32.totalorder %v1716_v18, 8  ;;  %vm1275_vm2 = vcmp.eq.s32.totalorder %v1716_v18, 9  ;;  %vm1278_vm3 = vcmp.eq.s32.totalorder %v1716_v18, 10  ;;  %vm1281_vm4 = vcmp.eq.s32.totalorder %v1716_v18, 11 }
 0x277   :  { %v1284_v22 = vsel %vm1248_vm9, %v1233_v19, 0.0  ;;  %v1287_v23 = vsel %vm1251_vm10, %v1233_v19, 0.0  ;;  %v1290_v24 = vsel %vm1254_vm11, %v1233_v19, 0.0  ;;  %v1293_v25 = vsel %vm1257_vm12, %v1233_v19, 0.0 }
 0x278   :  { %v1296_v26 = vsel %vm1260_vm13, %v1233_v19, 0.0  ;;  %v1299_v27 = vsel %vm1263_vm14, %v1233_v19, 0.0  ;;  %v1302_v28 = vsel %vm1266_vm15, %v1233_v19, 0.0  ;;  %v1305_v29 = vsel %vm1269_vm0, %v1233_v19, 0.0  ;;  %1321 = vst.msk [vmem:[#allocation8] sm:$0xff] %vm1320_vm8, %v1284_v22  ;;  %1324 = vst.msk [vmem:[#allocation8 + $0x18] sm:$0xff] %vm1320_vm8, %v1287_v23 }
 0x279   :  { %1327 = vst.msk [vmem:[#allocation8 + $0x30] sm:$0xff] %vm1320_vm8, %v1290_v24  ;;  %1330 = vst.msk [vmem:[#allocation8 + $0x48] sm:$0xff] %vm1320_vm8, %v1293_v25  ;;  %v1308_v30 = vsel %vm1272_vm1, %v1233_v19, 0.0  ;;  %v1311_v5 = vsel %vm1275_vm2, %v1233_v19, 0.0  ;;  %v1314_v6 = vsel %vm1278_vm3, %v1233_v19, 0.0  ;;  %v1317_v14 = vsel %vm1281_vm4, %v1233_v19, 0.0 }
 0x27a   :  { %1333 = vst.msk [vmem:[#allocation8 + $0x60] sm:$0xff] %vm1320_vm8, %v1296_v26  ;;  %1336 = vst.msk [vmem:[#allocation8 + $0x78] sm:$0xff] %vm1320_vm8, %v1299_v27  ;;  %v1717_v31 = vtrunc.f32 %v1243_v20  ;;  %v1241_v32 = vmax.f32 %v1238_v21, 0.0 }
 0x27b   :  { %1339 = vst.msk [vmem:[#allocation8 + $0x90] sm:$0xff] %vm1320_vm8, %v1302_v28  ;;  %1342 = vst.msk [vmem:[#allocation8 + $0xa8] sm:$0xff] %vm1320_vm8, %v1305_v29 }
 0x27c   :  { %1345 = vst.msk [vmem:[#allocation8 + $0xc0] sm:$0xff] %vm1320_vm8, %v1308_v30  ;;  %1348 = vst.msk [vmem:[#allocation8 + $0xd8] sm:$0xff] %vm1320_vm8, %v1311_v5  ;;  %v1718_v33 = vcvt.f32.s32 %v1717_v31  ;;  %v1244_v35 = vmin.f32 %v1241_v32, 11.0 }
 0x27d   :  { %1351 = vst.msk [vmem:[#allocation8 + $0xf0] sm:$0xff] %vm1320_vm8, %v1314_v6  ;;  %1354 = vst.msk [vmem:[#allocation8 + $0x108] sm:$0xff] %vm1320_vm8, %v1317_v14 }
 0x27e   :  { %vm1249_vm5 = vcmp.eq.s32.totalorder %v1718_v33, 0  ;;  %vm1252_vm6 = vcmp.eq.s32.totalorder %v1718_v33, 1  ;;  %vm1255_vm7 = vcmp.eq.s32.totalorder %v1718_v33, 2  ;;  %vm1258_vm9 = vcmp.eq.s32.totalorder %v1718_v33, 3 }
 0x27f   :  { %vm1261_vm10 = vcmp.eq.s32.totalorder %v1718_v33, 4  ;;  %vm1264_vm11 = vcmp.eq.s32.totalorder %v1718_v33, 5  ;;  %vm1267_vm12 = vcmp.eq.s32.totalorder %v1718_v33, 6  ;;  %vm1270_vm13 = vcmp.eq.s32.totalorder %v1718_v33, 7 }
 0x280   :  { %vm1273_vm14 = vcmp.eq.s32.totalorder %v1718_v33, 8  ;;  %vm1276_vm15 = vcmp.eq.s32.totalorder %v1718_v33, 9  ;;  %vm1279_vm0 = vcmp.eq.s32.totalorder %v1718_v33, 10  ;;  %vm1282_vm1 = vcmp.eq.s32.totalorder %v1718_v33, 11 }
 0x281   :  { %v1285_v36 = vsel %vm1249_vm5, %v1234_v34, 0.0  ;;  %v1288_v37 = vsel %vm1252_vm6, %v1234_v34, 0.0  ;;  %v1291_v38 = vsel %vm1255_vm7, %v1234_v34, 0.0  ;;  %v1294_v39 = vsel %vm1258_vm9, %v1234_v34, 0.0 }
 0x282   :  { %v1297_v40 = vsel %vm1261_vm10, %v1234_v34, 0.0  ;;  %v1300_v41 = vsel %vm1264_vm11, %v1234_v34, 0.0  ;;  %v1303_v42 = vsel %vm1267_vm12, %v1234_v34, 0.0  ;;  %v1306_v43 = vsel %vm1270_vm13, %v1234_v34, 0.0  ;;  %1322 = vst.msk [vmem:[#allocation8 + $0x8] sm:$0xff] %vm1320_vm8, %v1285_v36  ;;  %1325 = vst.msk [vmem:[#allocation8 + $0x20] sm:$0xff] %vm1320_vm8, %v1288_v37 }
 0x283   :  { %1328 = vst.msk [vmem:[#allocation8 + $0x38] sm:$0xff] %vm1320_vm8, %v1291_v38  ;;  %1331 = vst.msk [vmem:[#allocation8 + $0x50] sm:$0xff] %vm1320_vm8, %v1294_v39  ;;  %v1309_v44 = vsel %vm1273_vm14, %v1234_v34, 0.0  ;;  %v1312_v45 = vsel %vm1276_vm15, %v1234_v34, 0.0  ;;  %v1315_v46 = vsel %vm1279_vm0, %v1234_v34, 0.0  ;;  %v1318_v47 = vsel %vm1282_vm1, %v1234_v34, 0.0 }
 0x284   :  { %1334 = vst.msk [vmem:[#allocation8 + $0x68] sm:$0xff] %vm1320_vm8, %v1297_v40  ;;  %1337 = vst.msk [vmem:[#allocation8 + $0x80] sm:$0xff] %vm1320_vm8, %v1300_v41  ;;  %v1719_v48 = vtrunc.f32 %v1244_v35 }
 0x285   :  { %1340 = vst.msk [vmem:[#allocation8 + $0x98] sm:$0xff] %vm1320_vm8, %v1303_v42  ;;  %1343 = vst.msk [vmem:[#allocation8 + $0xb0] sm:$0xff] %vm1320_vm8, %v1306_v43 }
 0x286   :  { %1346 = vst.msk [vmem:[#allocation8 + $0xc8] sm:$0xff] %vm1320_vm8, %v1309_v44  ;;  %1349 = vst.msk [vmem:[#allocation8 + $0xe0] sm:$0xff] %vm1320_vm8, %v1312_v45  ;;  %v1720_v49 = vcvt.f32.s32 %v1719_v48 }
 0x287   :  { %1352 = vst.msk [vmem:[#allocation8 + $0xf8] sm:$0xff] %vm1320_vm8, %v1315_v46  ;;  %1355 = vst.msk [vmem:[#allocation8 + $0x110] sm:$0xff] %vm1320_vm8, %v1318_v47 }
 0x288   :  { %vm1250_vm2 = vcmp.eq.s32.totalorder %v1720_v49, 0  ;;  %vm1253_vm3 = vcmp.eq.s32.totalorder %v1720_v49, 1  ;;  %vm1256_vm4 = vcmp.eq.s32.totalorder %v1720_v49, 2  ;;  %vm1259_vm5 = vcmp.eq.s32.totalorder %v1720_v49, 3 }
 0x289   :  { %vm1262_vm6 = vcmp.eq.s32.totalorder %v1720_v49, 4  ;;  %vm1265_vm7 = vcmp.eq.s32.totalorder %v1720_v49, 5  ;;  %vm1268_vm9 = vcmp.eq.s32.totalorder %v1720_v49, 6  ;;  %vm1271_vm10 = vcmp.eq.s32.totalorder %v1720_v49, 7 }
 0x28a   :  { %vm1274_vm11 = vcmp.eq.s32.totalorder %v1720_v49, 8  ;;  %vm1277_vm12 = vcmp.eq.s32.totalorder %v1720_v49, 9  ;;  %vm1280_vm13 = vcmp.eq.s32.totalorder %v1720_v49, 10  ;;  %vm1283_vm14 = vcmp.eq.s32.totalorder %v1720_v49, 11 }
 0x28b   :  { %v1286_v51 = vsel %vm1250_vm2, %v1235_v50, 0.0  ;;  %v1289_v52 = vsel %vm1253_vm3, %v1235_v50, 0.0  ;;  %v1292_v53 = vsel %vm1256_vm4, %v1235_v50, 0.0  ;;  %v1295_v54 = vsel %vm1259_vm5, %v1235_v50, 0.0 }
 0x28c   :  { %v1298_v55 = vsel %vm1262_vm6, %v1235_v50, 0.0  ;;  %v1301_v56 = vsel %vm1265_vm7, %v1235_v50, 0.0  ;;  %v1304_v57 = vsel %vm1268_vm9, %v1235_v50, 0.0  ;;  %v1307_v58 = vsel %vm1271_vm10, %v1235_v50, 0.0  ;;  %1323 = vst.msk [vmem:[#allocation8 + $0x10] sm:$0xff] %vm1320_vm8, %v1286_v51  ;;  %1326 = vst.msk [vmem:[#allocation8 + $0x28] sm:$0xff] %vm1320_vm8, %v1289_v52 }
 0x28d   :  { %1329 = vst.msk [vmem:[#allocation8 + $0x40] sm:$0xff] %vm1320_vm8, %v1292_v53  ;;  %1332 = vst.msk [vmem:[#allocation8 + $0x58] sm:$0xff] %vm1320_vm8, %v1295_v54  ;;  %v1310_v59 = vsel %vm1274_vm11, %v1235_v50, 0.0  ;;  %v1313_v60 = vsel %vm1277_vm12, %v1235_v50, 0.0  ;;  %v1316_v61 = vsel %vm1280_vm13, %v1235_v50, 0.0  ;;  %v1319_v62 = vsel %vm1283_vm14, %v1235_v50, 0.0 }
 0x28e   :  { %1335 = vst.msk [vmem:[#allocation8 + $0x70] sm:$0xff] %vm1320_vm8, %v1298_v55  ;;  %1338 = vst.msk [vmem:[#allocation8 + $0x88] sm:$0xff] %vm1320_vm8, %v1301_v56 }
 0x28f   :  { %1341 = vst.msk [vmem:[#allocation8 + $0xa0] sm:$0xff] %vm1320_vm8, %v1304_v57  ;;  %1344 = vst.msk [vmem:[#allocation8 + $0xb8] sm:$0xff] %vm1320_vm8, %v1307_v58 }
 0x290   :  { %1347 = vst.msk [vmem:[#allocation8 + $0xd0] sm:$0xff] %vm1320_vm8, %v1310_v59  ;;  %1350 = vst.msk [vmem:[#allocation8 + $0xe8] sm:$0xff] %vm1320_vm8, %v1313_v60 }
 0x291   :  { %1353 = vst.msk [vmem:[#allocation8 + $0x100] sm:$0xff] %vm1320_vm8, %v1316_v61  ;;  %1356 = vst.msk [vmem:[#allocation8 + $0x118] sm:$0xff] %vm1320_vm8, %v1319_v62 }
 0x292   :  { %1775 = shalt.err (!%p1772_p3)
}
 0x293   :  { %s1776_s14 = scalar_lea.hbm %s2078_s3, 4608 }
 0x294   :  { %p1777_p4 = scmp.ne.s32.totalorder %s2078_s3, %s1776_s14  ;;  %p1780_p5 = scmp.lt.u32.totalorder %s1776_s14, %s2078_s3 }
 0x296   :  { %p1782_p6 = pnand %p1780_p5, %p1777_p4 }
 0x298   :  { %1785 = shalt.err (!%p1782_p6)
}
 0x299   :  { %1368 = dma.vmem_to_hbm [thread:$0]  %s1363_s10, 4608, %s2078_s3, [#allocation5], %s1794_s26, %s1794_s26, %s1795_s27  }
 0x29a   :  { %1790 = dma.done.wait [#allocation5], 4608  }
 0x29b   :  { %1791 = vsyncadd [#allocation5], 4294962688 }
 0x29c   :  { %1372 = vsyncpa [#allocation4], 1 }
 0x29d   :  { %1373 = vsyncpa [#allocation5], 1 }
 0x29e   :  { %1374 = vsyncpa [#allocation6], 1 }

</bundles_post_ra>
